<compile_context>
chip_gen: v7x
topology: tpu7x:2x2x1
jax: 0.10.0
libtpu: 0.0.40
codegen_flags: <defaults>
</compile_context>

<pallas_src>
import functools

import jax
import jax.numpy as jnp
from jax.experimental import pallas as pl
from jax.experimental.pallas import tpu as pltpu

MASK_VALUE = -9000000000000000.0  # matches masked_fill constant in the module


def gat_kernel(x_k_ref, adj_ref, f1_ref, f2_ref, wt_ref, o_ref,
               m_sc, l_sc, acc_sc, *, alpha, mm_dtype):
    ki = pl.program_id(2)

    @pl.when(ki == 0)
    def _init():
        # Init running max to MASK_VALUE (not -inf) so fully-masked rows
        # cannot produce exp(-inf - -inf) = NaN.
        m_sc[...] = jnp.full_like(m_sc, MASK_VALUE)
        l_sc[...] = jnp.zeros_like(l_sc)
        acc_sc[...] = jnp.zeros_like(acc_sc)

    bt, tk, din = x_k_ref.shape
    hpad = wt_ref.shape[1]

    # Project this tile's key rows.  Din is tiny, so recomputing hk per q-tile
    # is cheaper (HBM-wise) than streaming the Hpad-wide h from HBM.
    xk = x_k_ref[...].astype(wt_ref.dtype)
    hk = jnp.dot(xk.reshape(bt * tk, din), wt_ref[...],
                 preferred_element_type=jnp.float32).reshape(bt, tk, hpad)

    # e[b,i,j] = leaky_relu(f1[b,i] + f2[b,j]); mask where there is no edge.
    # int8 adjacency is compared directly -- no f32 convert pass.
    e = f1_ref[...] + f2_ref[...]                                   # (bt,tq,tk)
    e = jnp.where(e > 0, e, alpha * e)                              # LeakyReLU
    e = jnp.where(adj_ref[...] != 0, e, MASK_VALUE)

    # Online-softmax update over key tiles (unnormalized accumulation).
    m_prev = m_sc[...]
    m_new = jnp.maximum(m_prev, jnp.max(e, axis=-1, keepdims=True))
    corr = jnp.exp(m_prev - m_new)
    p = jnp.exp(e - m_new)                                          # (bt,tq,tk)
    l_sc[...] = corr * l_sc[...] + jnp.sum(p, axis=-1, keepdims=True)
    acc_sc[...] = corr * acc_sc[...] + jnp.einsum(
        'bqk,bkh->bqh', p.astype(mm_dtype), hk.astype(mm_dtype),
        preferred_element_type=jnp.float32)
    m_sc[...] = m_new

    @pl.when(ki == pl.num_programs(2) - 1)
    def _finalize():
        # Deferred normalization: one reciprocal per row instead of N^2
        # divides.  Exact reciprocal keeps the 1e-4 fidelity target.
        out = acc_sc[...] * pl.reciprocal(l_sc[...], approx=False)
        # ELU: exp(min(x,0)) - 1 avoids exp overflow on positives.
        out = jnp.where(out > 0, out, jnp.exp(jnp.minimum(out, 0.0)) - 1.0)
        o_ref[...] = out.astype(o_ref.dtype)


def _round_up(v, m):
    return ((v + m - 1) // m) * m


def _largest_divisor(n, cap, mult):
    """Largest t <= cap with n % t == 0 and t % mult == 0 (mult divides n)."""
    best = mult
    for t in range(mult, cap + 1, mult):
        if n % t == 0:
            best = t
    return best


def _plan_tiles(n, tq_cap, tk_cap):
    """Return (padded N, TQ, TK)."""
    if n <= tq_cap and n <= tk_cap:
        # Small graph: full-axis blocks (block dims == array dims, so the
        # (8,128)/(32,128) divisibility constraints do not apply).
        return n, n, n
    # Large graph: pad N to a multiple of 128 so tile-friendly divisors always
    # exist (never fall back to an O(N^2) full-axis score tile in VMEM).
    n_pad = _round_up(n, 128)
    tq = _largest_divisor(n_pad, tq_cap, 32)     # int8 adjacency sublane tile
    tk = _largest_divisor(n_pad, tk_cap, 128)    # lane-dense key tiles
    return n_pad, tq, tk


def _tpu_generation():
    try:
        kind = jax.devices()[0].device_kind.lower()
    except Exception:
        return None
    if "v5" in kind:
        return "v5"
    if "v6" in kind:
        return "v6"
    if "v7" in kind or "7x" in kind:
        return "v7"
    return None


def _spec(block_shape, index_map, buffer_count=None):
    """BlockSpec, optionally with deeper pipelining (falls back gracefully)."""
    if buffer_count is not None:
        try:
            return pl.BlockSpec(block_shape, index_map,
                                pipeline_mode=pl.Buffered(buffer_count))
        except Exception:
            pass
    return pl.BlockSpec(block_shape, index_map)


def gat_forward(x, adj, W, a, *, alpha=0.2, use_bf16_matmul=False):
    """Pallas GAT forward (concat=True branch).

    x:   [bs, N, Din] float32
    adj: [bs, N, N]   float/bool/int8; nonzero == edge (matches adj == 0 mask)
    W:   [H, Din]     torch linear_layer.weight  (h = x @ W.T)
    a:   [1, 2H]      torch attn_layer.weight
    """
    bs, N, Din = x.shape
    H = W.shape[0]
    Hpad = _round_up(H, 128)
    gen = _tpu_generation()

    # ---- generation-aware tile caps / VMEM budget --------------------------
    if gen in ("v5", "v6"):            # 128 MiB physical VMEM
        tq_cap, tk_cap, vmem_limit, buf_depth = 512, 1024, 96 << 20, None
    elif gen == "v7":                  # 64 MiB physical VMEM, 2 TensorCores
        tq_cap, tk_cap, vmem_limit, buf_depth = 256, 512, 48 << 20, 3
    else:                              # unknown: conservative
        tq_cap, tk_cap, vmem_limit, buf_depth = 256, 512, 48 << 20, None

    n_pad, TQ, TK = _plan_tiles(N, tq_cap, tk_cap)

    # ---- host-side precompute hoisted out of the k-loop ---------------------
    # h is only needed here to form the scalar logits f1/f2; the kernel
    # recomputes the Hpad-wide h for aggregation from x (Din << Hpad).
    h = jnp.einsum('bnd,hd->bnh', x, W).astype(jnp.float32)         # (bs,N,H)
    f1 = jnp.einsum('bnh,h->bn', h, a[0, :H])[..., None]            # (bs,N,1)
    f2 = jnp.einsum('bnh,h->bn', h, a[0, H:])[:, None, :]           # (bs,1,N)

    mm_dtype = jnp.bfloat16 if use_bf16_matmul else jnp.float32
    # Zero-pad the hidden dim so the output block is lane-dense (128 lanes).
    Wt = jnp.zeros((Din, Hpad), mm_dtype).at[:, :H].set(W.T.astype(mm_dtype))

    # Adjacency: accept bool/int8 directly so callers can cache the cheap form
    # and skip an N^2 f32 pass per layer/step.
    if adj.dtype == jnp.int8:
        adj_i8 = adj
    elif adj.dtype == jnp.bool_:
        adj_i8 = adj.astype(jnp.int8)
    else:
        adj_i8 = (adj != 0).astype(jnp.int8)
    # TODO(synk): for very large N on v5e-class HBM, bit-pack adjacency to
    # 1 bit/edge in HBM and unpack with shifts/compares in-kernel.

    # ---- pad N for tile-friendliness; padded keys are masked (exp -> 0),
    # padded query rows are sliced off below. --------------------------------
    if n_pad != N:
        dp = n_pad - N
        x = jnp.pad(x, ((0, 0), (0, dp), (0, 0)))
        adj_i8 = jnp.pad(adj_i8, ((0, 0), (0, dp), (0, dp)))
        f1 = jnp.pad(f1, ((0, 0), (0, dp), (0, 0)))
        f2 = jnp.pad(f2, ((0, 0), (0, 0), (0, dp)))

    n_qtiles = n_pad // TQ
    n_ktiles = n_pad // TK

    # ---- batch tiling: amortize per-grid-step overhead on small graphs, but
    # on v7x keep >= 2 iterations on the parallel axes (2 TensorCores). -------
    B_TILE = 1
    for c in range(1, bs + 1):
        if bs % c != 0 or c * TQ > 512:
            continue
        if gen == "v7" and (bs // c) * n_qtiles < 2:
            continue
        B_TILE = c

    grid = (bs // B_TILE, n_qtiles, n_ktiles)

    # Only buffer deeper than double when there are enough k-steps to hide.
    buf = buf_depth if (buf_depth is not None and n_ktiles >= buf_depth) else None

    flops = int(
        bs * (2 * n_pad * Din * Hpad * n_qtiles        # key projection per q-tile
              + 2 * n_pad * n_pad * Hpad               # p @ h aggregation
              + 10 * n_pad * n_pad))                   # leaky/mask/online-softmax
    transcendentals = int(
        bs * (n_pad * n_pad + n_pad * n_ktiles + n_pad * (1 + Hpad)))
    bytes_accessed = int(
        bs * n_pad * Din * 4 * n_qtiles                # x key rows per q-tile
        + bs * n_pad * n_pad                           # adjacency (int8)
        + bs * n_pad * 4 * (1 + n_qtiles)              # f1 + f2 streams
        + Wt.size * Wt.dtype.itemsize                  # resident weights
        + bs * n_pad * Hpad * 4)                       # output

    in_specs = [
        _spec((B_TILE, TK, Din), lambda b, qi, ki: (b, ki, 0), buf),   # x (key rows)
        _spec((B_TILE, TQ, TK), lambda b, qi, ki: (b, qi, ki), buf),   # adjacency int8
        pl.BlockSpec((B_TILE, TQ, 1), lambda b, qi, ki: (b, qi, 0)),   # f1 (resident over k)
        pl.BlockSpec((B_TILE, 1, TK), lambda b, qi, ki: (b, 0, ki)),   # f2
        pl.BlockSpec((Din, Hpad), lambda b, qi, ki: (0, 0)),           # W^T (resident)
    ]

    out_padded = pl.pallas_call(
        functools.partial(gat_kernel, alpha=alpha, mm_dtype=mm_dtype),
        out_shape=jax.ShapeDtypeStruct((bs, n_pad, Hpad), jnp.float32),
        grid_spec=pltpu.PrefetchScalarGridSpec(
            num_scalar_prefetch=0,
            grid=grid,
            in_specs=in_specs,
            out_specs=pl.BlockSpec((B_TILE, TQ, Hpad),
                                   lambda b, qi, ki: (b, qi, 0)),
            scratch_shapes=[
                pltpu.VMEM((B_TILE, TQ, 1), jnp.float32),     # running max
                pltpu.VMEM((B_TILE, TQ, 1), jnp.float32),     # running sum
                pltpu.VMEM((B_TILE, TQ, Hpad), jnp.float32),  # output accumulator
            ],
        ),
        compiler_params=pltpu.CompilerParams(
            dimension_semantics=("parallel", "parallel", "arbitrary"),
            vmem_limit_bytes=vmem_limit),
        cost_estimate=pl.CostEstimate(
            flops=flops, transcendentals=transcendentals,
            bytes_accessed=bytes_accessed),
    )(x, adj_i8, f1, f2, Wt)

    # Note: rows with NO edges at all get uniform attention over all (padded)
    # keys -- same "uniform garbage" the reference softmax produces for
    # isolated nodes.
    return out_padded[:, :N, :H]


def gat_reference(x, adj, W, a, *, alpha=0.2):
    """Pure-JAX reference mirroring the PyTorch forward (concat=True)."""
    H = W.shape[0]
    h = jnp.einsum("bnd,hd->bnh", x, W)
    f1 = h @ a[0, :H]
    f2 = h @ a[0, H:]
    e = f1[:, :, None] + f2[:, None, :]
    e = jnp.where(e > 0, e, alpha * e)
    e = jnp.where(adj == 0, MASK_VALUE, e)
    attn = jax.nn.softmax(e, axis=-1)
    out = jnp.einsum("bij,bjh->bih", attn, h)
    return jnp.where(out > 0, out, jnp.expm1(out))


if __name__ == "__main__":
    key = jax.random.PRNGKey(0)
    bs, N, dim_input, dim_hidden = 2, 16, 8, 32
    alpha = 0.2

    k_x, k_adj, k_w, k_a = jax.random.split(key, 4)

    x = jax.random.normal(k_x, (bs, N, dim_input), dtype=jnp.float32)

    # random sparse adjacency with self-loops
    adj = (jax.random.uniform(k_adj, (bs, N, N)) < 0.4).astype(jnp.float32)
    adj = jnp.maximum(adj, jnp.eye(N, dtype=jnp.float32)[None])

    # xavier_normal_ with gain = calculate_gain('relu') = sqrt(2)
    gain = jnp.sqrt(2.0)
    std_w = gain * jnp.sqrt(2.0 / (dim_input + dim_hidden))
    W = std_w * jax.random.normal(k_w, (dim_hidden, dim_input), dtype=jnp.float32)
    std_a = gain * jnp.sqrt(2.0 / (2 * dim_hidden + 1))
    a = std_a * jax.random.normal(k_a, (1, 2 * dim_hidden), dtype=jnp.float32)

    ref = gat_reference(x, adj, W, a, alpha=alpha)

    # Exact path (f32 MXU operands): must hold the 1e-4 fidelity target.
    out = jax.block_until_ready(gat_forward(x, adj, W, a, alpha=alpha))
    assert out.shape == (bs, N, dim_hidden)
    err = float(jnp.max(jnp.abs(out - ref)))
    assert jnp.allclose(out, ref, atol=1e-4, rtol=1e-4), \
        f"f32 path mismatch vs reference, max abs err={err}"

    # bf16-MXU path (review-suggested): bf16 operands, f32 accumulation.
    out_bf16 = jax.block_until_ready(
        gat_forward(x, adj, W, a, alpha=alpha, use_bf16_matmul=True))
    err_bf16 = float(jnp.max(jnp.abs(out_bf16 - ref)))
    assert jnp.allclose(out_bf16, ref, atol=5e-2, rtol=5e-2), \
        f"bf16 path mismatch vs reference, max abs err={err_bf16}"

    print("KERNEL_OK")
</pallas_src>

<mosaic_0001>
module attributes {stable_mosaic.version = 11 : i64} {
  func.func @gat_kernel(%arg0: i32, %arg1: i32, %arg2: i32, %arg3: memref<2x16x8xf32, #tpu.memory_space<vmem>>, %arg4: memref<2x16x16xi8, #tpu.memory_space<vmem>>, %arg5: memref<2x16x1xf32, #tpu.memory_space<vmem>>, %arg6: memref<2x1x16xf32, #tpu.memory_space<vmem>>, %arg7: memref<8x128xf32, #tpu.memory_space<vmem>>, %arg8: memref<2x16x128xf32, #tpu.memory_space<vmem>>, %arg9: memref<2x16x1xf32, #tpu.memory_space<vmem>>, %arg10: memref<2x16x1xf32, #tpu.memory_space<vmem>>, %arg11: memref<2x16x128xf32, #tpu.memory_space<vmem>>) attributes {dimension_semantics = [#tpu.dimension_semantics<parallel>, #tpu.dimension_semantics<parallel>, #tpu.dimension_semantics<arbitrary>], iteration_bounds = array<i64: 1, 1, 1>, scalar_prefetch = 0 : i64, scratch_operands = 3 : i64, tpu.core_type = #tpu.core_type<tc>, window_params = [{transform_indices = @transform_0, window_bounds = array<i64: 2, 16, 8>}, {transform_indices = @transform_1, window_bounds = array<i64: 2, 16, 16>}, {transform_indices = @transform_2, window_bounds = array<i64: 2, 16, 1>}, {transform_indices = @transform_3, window_bounds = array<i64: 2, 1, 16>}, {pipeline_mode = #tpu.pipeline_mode<synchronous>, transform_indices = @transform_4, window_bounds = array<i64: 8, 128>}, {transform_indices = @transform_5, window_bounds = array<i64: 2, 16, 128>}]} {
    %c0_i32 = arith.constant 0 : i32
    %0 = arith.cmpi eq, %arg2, %c0_i32 : i32
    %1 = arith.extui %0 : i1 to i32
    %c0_i32_0 = arith.constant 0 : i32
    %2 = arith.cmpi ne, %1, %c0_i32_0 : i32
    scf.if %2 {
      %cst_40 = arith.constant -9.000000e+15 : f32
      %48 = vector.broadcast %cst_40 : f32 to vector<2x16x1xf32>
      %c0_41 = arith.constant 0 : index
      %c0_42 = arith.constant 0 : index
      %c0_43 = arith.constant 0 : index
      %49 = vector.load %arg9[%c0_41, %c0_42, %c0_43] : memref<2x16x1xf32, #tpu.memory_space<vmem>>, vector<2x16x1xf32>
      tpu.vector_store %arg9[%c0_41, %c0_42, %c0_43], %48 {strides = array<i32>} : memref<2x16x1xf32, #tpu.memory_space<vmem>>, vector<2x16x1xf32>,
      %cst_44 = arith.constant 0.000000e+00 : f32
      %50 = vector.broadcast %cst_44 : f32 to vector<2x16x1xf32>
      %c0_45 = arith.constant 0 : index
      %c0_46 = arith.constant 0 : index
      %c0_47 = arith.constant 0 : index
      %51 = vector.load %arg10[%c0_45, %c0_46, %c0_47] : memref<2x16x1xf32, #tpu.memory_space<vmem>>, vector<2x16x1xf32>
      tpu.vector_store %arg10[%c0_45, %c0_46, %c0_47], %50 {strides = array<i32>} : memref<2x16x1xf32, #tpu.memory_space<vmem>>, vector<2x16x1xf32>,
      %cst_48 = arith.constant 0.000000e+00 : f32
      %52 = vector.broadcast %cst_48 : f32 to vector<2x16x128xf32>
      %c0_49 = arith.constant 0 : index
      %c0_50 = arith.constant 0 : index
      %c0_51 = arith.constant 0 : index
      %53 = vector.load %arg11[%c0_49, %c0_50, %c0_51] : memref<2x16x128xf32, #tpu.memory_space<vmem>>, vector<2x16x128xf32>
      tpu.vector_store %arg11[%c0_49, %c0_50, %c0_51], %52 {strides = array<i32>} : memref<2x16x128xf32, #tpu.memory_space<vmem>>, vector<2x16x128xf32>,
    } else {
    }
    %c0 = arith.constant 0 : index
    %c0_1 = arith.constant 0 : index
    %c0_2 = arith.constant 0 : index
    %3 = vector.load %arg3[%c0, %c0_1, %c0_2] : memref<2x16x8xf32, #tpu.memory_space<vmem>>, vector<2x16x8xf32>
    %4 = vector.shape_cast %3 : vector<2x16x8xf32> to vector<32x8xf32>
    %c0_3 = arith.constant 0 : index
    %c0_4 = arith.constant 0 : index
    %5 = vector.load %arg7[%c0_3, %c0_4] : memref<8x128xf32, #tpu.memory_space<vmem>>, vector<8x128xf32>
    %cst = arith.constant dense<0.000000e+00> : vector<32x128xf32>
    %6 = tpu.matmul %4, %5, %cst {dimension_numbers = #tpu.dot_dimension_numbers<[1], [0], [0], [1], [0, 0, 1, 1], [], []>} : vector<32x8xf32>, vector<8x128xf32>, vector<32x128xf32> -> vector<32x128xf32>
    %7 = vector.shape_cast %6 : vector<32x128xf32> to vector<2x16x128xf32>
    %c0_5 = arith.constant 0 : index
    %c0_6 = arith.constant 0 : index
    %c0_7 = arith.constant 0 : index
    %8 = vector.load %arg5[%c0_5, %c0_6, %c0_7] : memref<2x16x1xf32, #tpu.memory_space<vmem>>, vector<2x16x1xf32>
    %c0_8 = arith.constant 0 : index
    %c0_9 = arith.constant 0 : index
    %c0_10 = arith.constant 0 : index
    %9 = vector.load %arg6[%c0_8, %c0_9, %c0_10] : memref<2x1x16xf32, #tpu.memory_space<vmem>>, vector<2x1x16xf32>
    %10 = vector.broadcast %8 : vector<2x16x1xf32> to vector<2x16x16xf32>
    %11 = vector.broadcast %9 : vector<2x1x16xf32> to vector<2x16x16xf32>
    %12 = arith.addf %10, %11 : vector<2x16x16xf32>
    %cst_11 = arith.constant 0.000000e+00 : f32
    %13 = vector.broadcast %cst_11 : f32 to vector<2x16x16xf32>
    %14 = arith.cmpf ogt, %12, %13 : vector<2x16x16xf32>
    %cst_12 = arith.constant 2.000000e-01 : f32
    %15 = vector.broadcast %cst_12 : f32 to vector<2x16x16xf32>
    %16 = arith.mulf %15, %12 : vector<2x16x16xf32>
    %17 = arith.select %14, %12, %16 : vector<2x16x16xi1>, vector<2x16x16xf32>
    %c0_13 = arith.constant 0 : index
    %c0_14 = arith.constant 0 : index
    %c0_15 = arith.constant 0 : index
    %18 = vector.load %arg4[%c0_13, %c0_14, %c0_15] : memref<2x16x16xi8, #tpu.memory_space<vmem>>, vector<2x16x16xi8>
    %c0_i8 = arith.constant 0 : i8
    %19 = vector.broadcast %c0_i8 : i8 to vector<2x16x16xi8>
    %20 = arith.cmpi ne, %18, %19 : vector<2x16x16xi8>
    %cst_16 = arith.constant -9.000000e+15 : f32
    %21 = vector.broadcast %cst_16 : f32 to vector<2x16x16xf32>
    %22 = arith.select %20, %17, %21 : vector<2x16x16xi1>, vector<2x16x16xf32>
    %c0_17 = arith.constant 0 : index
    %c0_18 = arith.constant 0 : index
    %c0_19 = arith.constant 0 : index
    %23 = vector.load %arg9[%c0_17, %c0_18, %c0_19] : memref<2x16x1xf32, #tpu.memory_space<vmem>>, vector<2x16x1xf32>
    %cst_20 = arith.constant dense<0xFF800000> : vector<2x16xf32>
    %24 = vector.multi_reduction <maximumf>, %22, %cst_20 [2] : vector<2x16x16xf32> to vector<2x16xf32>
    %25 = vector.shape_cast %24 : vector<2x16xf32> to vector<2x16x1xf32>
    %26 = arith.maximumf %23, %25 : vector<2x16x1xf32>
    %27 = arith.subf %23, %26 : vector<2x16x1xf32>
    %28 = math.exp %27 : vector<2x16x1xf32>
    %29 = vector.broadcast %26 : vector<2x16x1xf32> to vector<2x16x16xf32>
    %30 = arith.subf %22, %29 : vector<2x16x16xf32>
    %31 = math.exp %30 : vector<2x16x16xf32>
    %c0_21 = arith.constant 0 : index
    %c0_22 = arith.constant 0 : index
    %c0_23 = arith.constant 0 : index
    %32 = vector.load %arg10[%c0_21, %c0_22, %c0_23] : memref<2x16x1xf32, #tpu.memory_space<vmem>>, vector<2x16x1xf32>
    %33 = arith.mulf %28, %32 : vector<2x16x1xf32>
    %cst_24 = arith.constant dense<0.000000e+00> : vector<2x16xf32>
    %34 = vector.multi_reduction <add>, %31, %cst_24 [2] : vector<2x16x16xf32> to vector<2x16xf32>
    %35 = vector.shape_cast %34 : vector<2x16xf32> to vector<2x16x1xf32>
    %36 = arith.addf %33, %35 : vector<2x16x1xf32>
    %c0_25 = arith.constant 0 : index
    %c0_26 = arith.constant 0 : index
    %c0_27 = arith.constant 0 : index
    %37 = vector.load %arg10[%c0_25, %c0_26, %c0_27] : memref<2x16x1xf32, #tpu.memory_space<vmem>>, vector<2x16x1xf32>
    tpu.vector_store %arg10[%c0_25, %c0_26, %c0_27], %36 {strides = array<i32>} : memref<2x16x1xf32, #tpu.memory_space<vmem>>, vector<2x16x1xf32>,
    %c0_28 = arith.constant 0 : index
    %c0_29 = arith.constant 0 : index
    %c0_30 = arith.constant 0 : index
    %38 = vector.load %arg11[%c0_28, %c0_29, %c0_30] : memref<2x16x128xf32, #tpu.memory_space<vmem>>, vector<2x16x128xf32>
    %39 = vector.broadcast %28 : vector<2x16x1xf32> to vector<2x16x128xf32>
    %40 = arith.mulf %39, %38 : vector<2x16x128xf32>
    "tpu.trace_start"() <{level = 10 : i32, message = "bqk,bkh->bqh"}> : () -> ()
    %cst_31 = arith.constant dense<0.000000e+00> : vector<2x16x128xf32>
    %41 = tpu.matmul %31, %7, %cst_31 {dimension_numbers = #tpu.dot_dimension_numbers<[2], [1], [1], [2], [0, 0, 0, 1, 1, 2], [0], [0]>} : vector<2x16x16xf32>, vector<2x16x128xf32>, vector<2x16x128xf32> -> vector<2x16x128xf32>
    "tpu.trace_stop"() : () -> ()
    %42 = arith.addf %40, %41 : vector<2x16x128xf32>
    %c0_32 = arith.constant 0 : index
    %c0_33 = arith.constant 0 : index
    %c0_34 = arith.constant 0 : index
    %43 = vector.load %arg11[%c0_32, %c0_33, %c0_34] : memref<2x16x128xf32, #tpu.memory_space<vmem>>, vector<2x16x128xf32>
    tpu.vector_store %arg11[%c0_32, %c0_33, %c0_34], %42 {strides = array<i32>} : memref<2x16x128xf32, #tpu.memory_space<vmem>>, vector<2x16x128xf32>,
    %c0_35 = arith.constant 0 : index
    %c0_36 = arith.constant 0 : index
    %c0_37 = arith.constant 0 : index
    %44 = vector.load %arg9[%c0_35, %c0_36, %c0_37] : memref<2x16x1xf32, #tpu.memory_space<vmem>>, vector<2x16x1xf32>
    tpu.vector_store %arg9[%c0_35, %c0_36, %c0_37], %26 {strides = array<i32>} : memref<2x16x1xf32, #tpu.memory_space<vmem>>, vector<2x16x1xf32>,
    %c0_i32_38 = arith.constant 0 : i32
    %45 = arith.cmpi eq, %arg2, %c0_i32_38 : i32
    %46 = arith.extui %45 : i1 to i32
    %c0_i32_39 = arith.constant 0 : i32
    %47 = arith.cmpi ne, %46, %c0_i32_39 : i32
    scf.if %47 {
      %c0_40 = arith.constant 0 : index
      %c0_41 = arith.constant 0 : index
      %c0_42 = arith.constant 0 : index
      %48 = vector.load %arg11[%c0_40, %c0_41, %c0_42] : memref<2x16x128xf32, #tpu.memory_space<vmem>>, vector<2x16x128xf32>
      %c0_43 = arith.constant 0 : index
      %c0_44 = arith.constant 0 : index
      %c0_45 = arith.constant 0 : index
      %49 = vector.load %arg10[%c0_43, %c0_44, %c0_45] : memref<2x16x1xf32, #tpu.memory_space<vmem>>, vector<2x16x1xf32>
      %50 = tpu.reciprocal %49 : vector<2x16x1xf32> -> vector<2x16x1xf32>
      %51 = vector.broadcast %50 : vector<2x16x1xf32> to vector<2x16x128xf32>
      %52 = arith.mulf %48, %51 : vector<2x16x128xf32>
      %cst_46 = arith.constant 0.000000e+00 : f32
      %53 = vector.broadcast %cst_46 : f32 to vector<2x16x128xf32>
      %54 = arith.cmpf ogt, %52, %53 : vector<2x16x128xf32>
      %cst_47 = arith.constant 0.000000e+00 : f32
      %55 = vector.broadcast %cst_47 : f32 to vector<2x16x128xf32>
      %56 = arith.minimumf %52, %55 : vector<2x16x128xf32>
      %57 = math.exp %56 : vector<2x16x128xf32>
      %cst_48 = arith.constant 1.000000e+00 : f32
      %58 = vector.broadcast %cst_48 : f32 to vector<2x16x128xf32>
      %59 = arith.subf %57, %58 : vector<2x16x128xf32>
      %60 = arith.select %54, %52, %59 : vector<2x16x128xi1>, vector<2x16x128xf32>
      %c0_49 = arith.constant 0 : index
      %c0_50 = arith.constant 0 : index
      %c0_51 = arith.constant 0 : index
      %61 = vector.load %arg8[%c0_49, %c0_50, %c0_51] : memref<2x16x128xf32, #tpu.memory_space<vmem>>, vector<2x16x128xf32>
      tpu.vector_store %arg8[%c0_49, %c0_50, %c0_51], %60 {strides = array<i32>} : memref<2x16x128xf32, #tpu.memory_space<vmem>>, vector<2x16x128xf32>,
    } else {
    }
    return
  }
  func.func @transform_0(%arg0: i32, %arg1: i32, %arg2: i32) -> (i32, i32, i32) {
    %c0_i32 = arith.constant 0 : i32
    %c0_i32_0 = arith.constant 0 : i32
    return %arg0, %arg2, %c0_i32 : i32, i32, i32
  }
  func.func @transform_1(%arg0: i32, %arg1: i32, %arg2: i32) -> (i32, i32, i32) {
    %c0_i32 = arith.constant 0 : i32
    return %arg0, %arg1, %arg2 : i32, i32, i32
  }
  func.func @transform_2(%arg0: i32, %arg1: i32, %arg2: i32) -> (i32, i32, i32) {
    %c0_i32 = arith.constant 0 : i32
    %c0_i32_0 = arith.constant 0 : i32
    return %arg0, %arg1, %c0_i32 : i32, i32, i32
  }
  func.func @transform_3(%arg0: i32, %arg1: i32, %arg2: i32) -> (i32, i32, i32) {
    %c0_i32 = arith.constant 0 : i32
    %c0_i32_0 = arith.constant 0 : i32
    return %arg0, %c0_i32, %arg2 : i32, i32, i32
  }
  func.func @transform_4(%arg0: i32, %arg1: i32, %arg2: i32) -> (i32, i32) {
    %c0_i32 = arith.constant 0 : i32
    %c0_i32_0 = arith.constant 0 : i32
    %c0_i32_1 = arith.constant 0 : i32
    return %c0_i32, %c0_i32_0 : i32, i32
  }
  func.func @transform_5(%arg0: i32, %arg1: i32, %arg2: i32) -> (i32, i32, i32) {
    %c0_i32 = arith.constant 0 : i32
    %c0_i32_0 = arith.constant 0 : i32
    return %arg0, %arg1, %c0_i32 : i32, i32, i32
  }
}

</mosaic_0001>

<bundles_post_ra>
// kernel: tpu_custom_call.1
= control target key start
LH: loop header
LB: loop body
LE: loop exit
PB: predicated region body
PF: predicated region fallthrough
CT: control target
= control target key end

     0   :  { %v721_v2 = vmov 0   ;;  %s862_s0 = inlined_call_operand.vmem [shape: f32[2,16,8], index: 0, kind: input, shape index: {}]   ;;  %s863_s1 = inlined_call_operand.vmem [shape: s8[2,16,16], index: 1, kind: input, shape index: {}]   ;;  %s864_s2 = inlined_call_operand.vmem [shape: f32[2,16,1], index: 2, kind: input, shape index: {}]   ;;  %s865_s3 = inlined_call_operand.vmem [shape: f32[2,1,16], index: 3, kind: input, shape index: {}]   ;;  %s866_s4 = inlined_call_operand.vmem [shape: f32[8,128], index: 4, kind: input, shape index: {}]   ;;  %s867_s5 = inlined_call_operand.hbm [shape: f32[2,16,128], index: 5, kind: output, shape index: {}]  }
   0x1   :  { %v145_v0 = vld [vmem:[%s864_s2 + $0x10] sm:$0xff]  ;;  %v143_v1 = vld [vmem:[%s864_s2] sm:$0xff]  ;;  %664 = vset.pattern.permute.xlu1 %v721_v2  ;;  %663 = vset.pattern.permute.xlu0 %v721_v2 }
   0x2   :  { %161 = vperm.xlu1 %664, %v145_v0   ;;  %151 = vperm.xlu0 %663, %v143_v1  }
   0x3   :  { %10 = vsyncpa [#allocation6], 0  ;;  %v146_v3 = vld [vmem:[%s864_s2 + $0x18] sm:$0xff]  ;;  %v144_v4 = vld [vmem:[%s864_s2 + $0x8] sm:$0xff]  ;;  %vm45_vm0 = vcmask 64512   ;;  %vm225_vm8 = vcmask 130048  }
   0x4   :  { %v44_v5 = vld [vmem:[%s866_s4] sm:$0xff]  ;;  %v41_v7 = vld [vmem:[%s862_s0 + $0x8] sm:$0xff]  ;;  %v42_v8 = vld [vmem:[%s862_s0 + $0x10] sm:$0xff]  ;;  %vm27_vm14 = vcmask 7168   ;;  %v722_v48 = vmov -9e+15  }
   0x5   :  { %v40_v6 = vld [vmem:[%s862_s0] sm:$0xff]  ;;  %627 = vmatprep.subr.mxu0 %v44_v5  ;;  %v43_v9 = vld [vmem:[%s862_s0 + $0x18] sm:$0xff]  ;;  %28 = vst.msk [vmem:[#allocation2] sm:$0xff] %vm27_vm14, %v722_v48  ;;  %29 = vst.msk [vmem:[#allocation2 + $0x8] sm:$0xff] %vm27_vm14, %v722_v48  ;;  %v723_v49 = vmov 0.0  }
   0x6   :  { %166 = vperm.xlu1 %664, %v146_v3   ;;  %156 = vperm.xlu0 %663, %v144_v4   ;;  %v197_v10 = vld [vmem:[%s863_s1] sm:$0x3]  ;;  %v199_v11 = vld [vmem:[%s863_s1 + $0x4] sm:$0x3]  ;;  %v198_v12 = vld [vmem:[%s863_s1 + $0x2] sm:$0x3] }
   0x7   :  { %629 = vmatprep.mubr.msk.f32.mxu0 %vm45_vm0, %v40_v6  ;;  %628 = vmatpush3.msra.mxu0 %v44_v5  ;;  %vm201_vm1 = vnez %v197_v10  ;;  %vm203_vm2 = vnez %v199_v11  ;;  %v200_v14 = vld [vmem:[%s863_s1 + $0x6] sm:$0x3]  ;;  %vm202_vm3 = vnez %v198_v12  ;;  %v605_v16 = vld [vmem:[%s865_s3 + $0x1] ss:$0 sm:$0xff]  ;;  %v604_v17 = vld [vmem:[%s865_s3] ss:$0 sm:$0xff] }
   0x8   :  { %630 = vmatmul.mubr.msk.f32.vlgmr.msra.gmra.mrb[0].mxu0 %vm45_vm0, %v41_v7  ;;  %v205_v13 = vsel %vm201_vm1, 16843009, %v721_v2  ;;  %v207_v15 = vsel %vm203_vm2, 16843009, %v721_v2  ;;  %vm204_vm4 = vnez %v200_v14  ;;  %v206_v19 = vsel %vm202_vm3, 16843009, %v721_v2 }
   0x9   :  { %632 = vmatprep.mubr.msk.f32.mxu0 %vm45_vm0, %v42_v8  ;;  %v209_v18 = vunpack.c.0.s8 %v205_v13  ;;  %v211_v22 = vunpack.c.0.s8 %v207_v15  ;;  %v208_v25 = vsel %vm204_vm4, 16843009, %v721_v2  ;;  %v210_v26 = vunpack.c.0.s8 %v206_v19  ;;  %30 = vst.msk [vmem:[#allocation2 + $0x10] sm:$0xff] %vm27_vm14, %v722_v48  ;;  %31 = vst.msk [vmem:[#allocation2 + $0x18] sm:$0xff] %vm27_vm14, %v722_v48  ;;  %s724_s1 = smov [#allocation5]  }
   0xa   :  { %v212_v31 = vunpack.c.0.s8 %v208_v25  ;;  %32 = vst.msk [vmem:[#allocation3] sm:$0xff] %vm27_vm14, %v723_v49  ;;  %33 = vst.msk [vmem:[#allocation3 + $0x8] sm:$0xff] %vm27_vm14, %v723_v49  ;;  %s589_s3 = sshll.u32 %s724_s1, 4  ;;  %s590_s3 = int_to_ptr.vmem [resolvable:$true] %s589_s3 }
   0xb   :  { %vm213_vm5 = vcmp.ne.s32.totalorder %v209_v18, 0  ;;  %vm215_vm9 = vcmp.ne.s32.totalorder %v211_v22, 0  ;;  %vm214_vm10 = vcmp.ne.s32.totalorder %v210_v26, 0  ;;  %34 = vst.msk [vmem:[#allocation3 + $0x10] sm:$0xff] %vm27_vm14, %v723_v49  ;;  %35 = vst.msk [vmem:[#allocation3 + $0x18] sm:$0xff] %vm27_vm14, %v723_v49  ;;  %s697_s20 = scalar_lea.vmem %s590_s3, 512  ;;  %p702_p1 = scmp.lt.s32.totalorder %s590_s3, %s590_s3 }
   0xc   :  { %633 = vmatmul.mubr.msk.f32.gmra.mrb[2].mxu0 %vm45_vm0, %v43_v9  ;;  %vm216_vm13 = vcmp.ne.s32.totalorder %v212_v31, 0  ;;  %v820_v50 = vld [vmem:[#allocation2] sm:$0xff]  ;;  %v823_v53 = vld [vmem:[#allocation2 + $0x8] sm:$0xff]  ;;  %p698_p0 = scmp.ne.s32.totalorder %s590_s3, %s697_s20  ;;  %p703_p2 = scmp.lt.s32.totalorder %s697_s20, %s697_s20 }
   0xe   :  { %p704_p3 = por %p703_p2, %p702_p1 }
  0x10   :  { %v825_v54 = vld [vmem:[#allocation2 + $0x10] sm:$0xff]  ;;  %v224_v60 = vld [vmem:[#allocation2 + $0x18] sm:$0xff]  ;;  %p705_p4 = pnand %p704_p3, %p698_p0 }
  0x81   :  { %v162_v20 = vpop.permute.xlu1 %161  ;;  %v152_v21 = vpop.permute.xlu0 %151 }
  0x82   :  { %v183_v23 = vadd.f32 %v605_v16, %v162_v20  ;;  %v181_v24 = vadd.f32 %v604_v17, %v152_v21 }
  0x84   :  { %v191_v27 = vmul.f32 0.2, %v183_v23  ;;  %v189_v28 = vmul.f32 0.2, %v181_v24  ;;  %vm185_vm6 = vcmp.gt.f32.partialorder %v181_v24, 0.0  ;;  %vm187_vm7 = vcmp.gt.f32.partialorder %v183_v23, 0.0 }
  0x85   :  { %v167_v29 = vpop.permute.xlu1 %166  ;;  %v157_v30 = vpop.permute.xlu0 %156 }
  0x86   :  { %v184_v32 = vadd.f32 %v605_v16, %v167_v29  ;;  %v182_v33 = vadd.f32 %v604_v17, %v157_v30  ;;  %v193_v34 = vsel %vm185_vm6, %v181_v24, %v189_v28  ;;  %v195_v35 = vsel %vm187_vm7, %v183_v23, %v191_v27 }
  0x87   :  { %v802_v36 = vsel %vm213_vm5, %v193_v34, -9e+15  ;;  %v806_v40 = vsel %vm215_vm9, %v195_v35, -9e+15 }
  0x88   :  { %v192_v37 = vmul.f32 0.2, %v184_v32  ;;  %v190_v38 = vmul.f32 0.2, %v182_v33  ;;  %v226_v39 = vsel %vm225_vm8, %v802_v36, -inf  ;;  %vm186_vm11 = vcmp.gt.f32.partialorder %v182_v33, 0.0 }
  0x89   :  { %227 = vmax.xlane.f32.xlu0 %v226_v39  ;;  %vm188_vm12 = vcmp.gt.f32.partialorder %v184_v32, 0.0  ;;  %v232_v44 = vsel %vm225_vm8, %v806_v40, -inf  ;;  %v287_v39 = vld [vmem:[#allocation3 + $0x8] sm:$0xff] }
  0x8a   :  { %v194_v41 = vsel %vm186_vm11, %v182_v33, %v190_v38  ;;  %v196_v42 = vsel %vm188_vm12, %v184_v32, %v192_v37 }
  0x8b   :  { %v218_v43 = vsel %vm214_vm10, %v194_v41, -9e+15  ;;  %v220_v46 = vsel %vm216_vm13, %v196_v42, -9e+15  ;;  %v288_v41 = vld [vmem:[#allocation3 + $0x10] sm:$0xff] }
  0x8c   :  { %v229_v45 = vsel %vm225_vm8, %v218_v43, -inf  ;;  %v235_v47 = vsel %vm225_vm8, %v220_v46, -inf }
  0x8d   :  { %233 = vmax.xlane.f32.xlu0 %v232_v44  ;;  %230 = vmax.xlane.f32.xlu1 %v229_v45 }
  0x91   :  { %236 = vmax.xlane.f32.xlu0 %v235_v47  ;;  %v289_v47 = vld [vmem:[#allocation3 + $0x18] sm:$0xff] }
  0xdb   :  { %v631_v2 = vpop.f32.mrb[0].mxu0 }
  0xdc   :  { %v124_v3 = vpop.f32.mrb[1].mxu0 }
  0xdd   :  { %v649_v4 = vpack.c.bf16 %v631_v2, %v124_v3 }
  0xdf   :  { %v634_v5 = vpop.f32.mrb[2].mxu0  ;;  %650 = vmatprep.subr.bf16.mxu1 %v649_v4 }
  0xe0   :  { %v134_v6 = vpop.f32.mrb[3].mxu0  ;;  %652 = vmatpush3.bf16.msra.mxu1 %v649_v4 }
  0xe1   :  { %v653_v7 = vpack.c.bf16 %v634_v5, %v134_v6 }
  0xe3   :  { %654 = vmatprep.subr.bf16.mxu1 %v653_v7 }
 0x116   :  { %v228_v51 = vpop.xlane.xlu0 %227 }
 0x117   :  { %v238_v52 = vmax.f32 %v820_v50, %v228_v51 }
 0x119   :  { %v242_v55 = vsub.f32 %v820_v50, %v238_v52  ;;  %513 = vst.msk [vmem:[#allocation2] sm:$0xff] %vm27_vm14, %v238_v52  ;;  %256 = vperm.xlu1 %664, %v238_v52  }
 0x11a   :  { %v231_v56 = vpop.xlane.xlu1 %230  ;;  %v234_v57 = vpop.xlane.xlu0 %233 }
 0x11b   :  { %v239_v58 = vmax.f32 %v823_v53, %v231_v56  ;;  %v240_v59 = vmax.f32 %v825_v54, %v234_v57  ;;  %v246_v27 = vmul.f32 1.442695, %v242_v55 }
 0x11d   :  { %v243_v61 = vsub.f32 %v823_v53, %v239_v58  ;;  %514 = vst.msk [vmem:[#allocation2 + $0x8] sm:$0xff] %vm27_vm14, %v239_v58  ;;  %v244_v62 = vsub.f32 %v825_v54, %v240_v59  ;;  %515 = vst.msk [vmem:[#allocation2 + $0x10] sm:$0xff] %vm27_vm14, %v240_v59  ;;  %261 = vperm.xlu0 %663, %v239_v58   ;;  %266 = vperm.xlu1 %664, %v240_v59  }
 0x11e   :  { %v237_v63 = vpop.xlane.xlu0 %236 }
 0x11f   :  { %v241_v0 = vmax.f32 %v224_v60, %v237_v63  ;;  %v250_v29 = vmul.f32 1.442695, %v244_v62  ;;  %v248_v31 = vmul.f32 1.442695, %v243_v61 }
 0x121   :  { %v245_v1 = vsub.f32 %v224_v60, %v241_v0  ;;  %516 = vst.msk [vmem:[#allocation2 + $0x18] sm:$0xff] %vm27_vm14, %v241_v0  ;;  %271 = vperm.xlu1 %664, %v241_v0  }
 0x123   :  { %v252_v30 = vmul.f32 1.442695, %v245_v1 }
 0x198   :  { %v257_v8 = vpop.permute.xlu1 %256 }
 0x199   :  { %v274_v9 = vsub.f32 %v802_v36, %v257_v8  ;;  %v286_v36 = vld [vmem:[#allocation3] sm:$0xff] }
 0x19b   :  { %v278_v10 = vmul.f32 1.442695, %v274_v9 }
 0x19c   :  { %v262_v11 = vpop.permute.xlu0 %261  ;;  %v267_v12 = vpop.permute.xlu1 %266 }
 0x19d   :  { %665 = vpow2.f32 %v278_v10  ;;  %v275_v13 = vsub.f32 %v218_v43, %v262_v11  ;;  %v276_v14 = vsub.f32 %v806_v40, %v267_v12 }
 0x19f   :  { %v280_v15 = vmul.f32 1.442695, %v275_v13  ;;  %v282_v16 = vmul.f32 1.442695, %v276_v14 }
 0x1a0   :  { %v272_v17 = vpop.permute.xlu1 %271 }
 0x1a1   :  { %667 = vpow2.f32 %v280_v15  ;;  %v277_v18 = vsub.f32 %v220_v46, %v272_v17 }
 0x1a2   :  { %669 = vpow2.f32 %v282_v16 }
 0x1a3   :  { %v284_v19 = vmul.f32 1.442695, %v277_v18 }
 0x1a5   :  { %671 = vpow2.f32 %v284_v19 }
 0x1a6   :  { %673 = vpow2.f32 %v246_v27 }
 0x1a7   :  { %v666_v20 = vpop.eup %665  ;;  %675 = vpow2.f32 %v250_v29 }
 0x1a8   :  { %639 = vmatprep.mubr.msk.f32.mxu1 %vm225_vm8, %v666_v20  ;;  %v294_v21 = vsel %vm225_vm8, %v666_v20, 0.0  ;;  %677 = vpow2.f32 %v252_v30 }
 0x1a9   :  { %295 = vadd.xlane.f32.xlu0 %v294_v21  ;;  %679 = vpow2.f32 %v248_v31 }
 0x1ab   :  { %v668_v22 = vpop.eup %667 }
 0x1ac   :  { %v670_v23 = vpop.eup %669  ;;  %640 = vmatmul.mubr.msk.f32.vlgmr.msra.gmra.mrb[0].mxu1 %vm225_vm8, %v668_v22  ;;  %v297_v24 = vsel %vm225_vm8, %v668_v22, 0.0 }
 0x1ad   :  { %298 = vadd.xlane.f32.xlu1 %v297_v24  ;;  %656 = vmatpush3.bf16.msra.mxu1 %v653_v7  ;;  %v300_v25 = vsel %vm225_vm8, %v670_v23, 0.0 }
 0x1ae   :  { %646 = vmatprep.mubr.msk.f32.mxu1 %vm225_vm8, %v670_v23  ;;  %301 = vadd.xlane.f32.xlu0 %v300_v25 }
 0x1af   :  { %v672_v26 = vpop.eup %671 }
 0x1b0   :  { %647 = vmatmul.mubr.msk.f32.vlgmr.msra.gmra.mrb[2].mxu1 %vm225_vm8, %v672_v26  ;;  %v303_v28 = vsel %vm225_vm8, %v672_v26, 0.0  ;;  %v674_v32 = vpop.eup %673 }
 0x1b1   :  { %v676_v33 = vpop.eup %675  ;;  %v290_v37 = vmul.f32 %v674_v32, %v286_v36 }
 0x1b2   :  { %304 = vadd.xlane.f32.xlu0 %v303_v28  ;;  %v678_v34 = vpop.eup %677  ;;  %v292_v43 = vmul.f32 %v676_v33, %v288_v41 }
 0x1b3   :  { %v680_v35 = vpop.eup %679  ;;  %v293_v49 = vmul.f32 %v678_v34, %v289_v47 }
 0x1b4   :  { %v291_v42 = vmul.f32 %v680_v35, %v287_v39 }
 0x1be   :  { %321 = vperm.xlu1 %664, %v674_v32  }
 0x1c2   :  { %331 = vperm.xlu1 %664, %v676_v33  }
 0x1c6   :  { %336 = vperm.xlu1 %664, %v678_v34  }
 0x1c8   :  { %326 = vperm.xlu0 %663, %v680_v35  }
 0x236   :  { %v296_v38 = vpop.xlane.xlu0 %295 }
 0x237   :  { %v306_v40 = vadd.f32 %v296_v38, %v290_v37 }
 0x239   :  { %311 = vst.msk [vmem:[#allocation3] sm:$0xff] %vm27_vm14, %v306_v40 }
 0x23a   :  { %v299_v44 = vpop.xlane.xlu1 %298 }
 0x23b   :  { %v302_v45 = vpop.xlane.xlu0 %301  ;;  %v307_v46 = vadd.f32 %v299_v44, %v291_v42 }
 0x23c   :  { %v308_v48 = vadd.f32 %v302_v45, %v292_v43 }
 0x23d   :  { %312 = vst.msk [vmem:[#allocation3 + $0x8] sm:$0xff] %vm27_vm14, %v307_v46 }
 0x23e   :  { %313 = vst.msk [vmem:[#allocation3 + $0x10] sm:$0xff] %vm27_vm14, %v308_v48  ;;  %v322_v0 = vpop.permute.xlu1 %321 }
 0x23f   :  { %v305_v50 = vpop.xlane.xlu0 %304  ;;  %v339_v3 = vmul.f32 0.0, %v322_v0 }
 0x240   :  { %v309_v51 = vadd.f32 %v305_v50, %v293_v49  ;;  %v524_v52 = vld [vmem:[#allocation3] sm:$0xff] }
 0x241   :  { %681 = vrcp.f32 %v524_v52 }
 0x242   :  { %314 = vst.msk [vmem:[#allocation3 + $0x18] sm:$0xff] %vm27_vm14, %v309_v51  ;;  %v332_v1 = vpop.permute.xlu1 %331 }
 0x243   :  { %v341_v9 = vmul.f32 0.0, %v332_v1 }
 0x244   :  { %v525_v53 = vld [vmem:[#allocation3 + $0x8] sm:$0xff] }
 0x245   :  { %683 = vrcp.f32 %v525_v53  ;;  %v526_v54 = vld [vmem:[#allocation3 + $0x10] sm:$0xff] }
 0x246   :  { %685 = vrcp.f32 %v526_v54  ;;  %v337_v5 = vpop.permute.xlu1 %336 }
 0x247   :  { %v327_v2 = vpop.permute.xlu0 %326  ;;  %v342_v17 = vmul.f32 0.0, %v337_v5 }
 0x248   :  { %v340_v7 = vmul.f32 0.0, %v327_v2 }
 0x249   :  { %v527_v55 = vld [vmem:[#allocation3 + $0x18] sm:$0xff] }
 0x24a   :  { %687 = vrcp.f32 %v527_v55 }
 0x24b   :  { %v682_v56 = vpop.eup %681 }
 0x24c   :  { %534 = vperm.xlu0 %663, %v682_v56  }
 0x24f   :  { %v684_v57 = vpop.eup %683 }
 0x250   :  { %v686_v58 = vpop.eup %685  ;;  %539 = vperm.xlu1 %664, %v684_v57  }
 0x251   :  { %544 = vperm.xlu0 %663, %v686_v58  }
 0x254   :  { %v688_v59 = vpop.eup %687 }
 0x255   :  { %549 = vperm.xlu1 %664, %v688_v59  }
 0x27f   :  { %v641_v60 = vpop.f32.mrb[0].mxu1 }
 0x280   :  { %v415_v61 = vpop.f32.mrb[1].mxu1  ;;  %v506_v10 = vadd.f32 %v641_v60, %v340_v7 }
 0x281   :  { %v505_v4 = vadd.f32 %v415_v61, %v339_v3 }
 0x283   :  { %v648_v62 = vpop.f32.mrb[2].mxu1 }
 0x284   :  { %v496_v63 = vpop.f32.mrb[3].mxu1  ;;  %v508_v20 = vadd.f32 %v648_v62, %v342_v17 }
 0x285   :  { %v507_v12 = vadd.f32 %v496_v63, %v341_v9 }
 0x2cb   :  { %v535_v6 = vpop.permute.xlu0 %534 }
 0x2cc   :  { %v552_v8 = vmul.f32 %v535_v6, %v505_v4 }
 0x2ce   :  { %v560_v11 = vmin.f32 %v552_v8, 0.0  ;;  %vm556_vm15 = vcmp.gt.f32.partialorder %v552_v8, 0.0 }
 0x2cf   :  { %v540_v13 = vpop.permute.xlu1 %539 }
 0x2d0   :  { %v564_v14 = vmul.f32 1.442695, %v560_v11  ;;  %v553_v15 = vmul.f32 %v540_v13, %v506_v10  ;;  %v545_v16 = vpop.permute.xlu0 %544 }
 0x2d1   :  { %v554_v18 = vmul.f32 %v545_v16, %v507_v12 }
 0x2d2   :  { %689 = vpow2.f32 %v564_v14  ;;  %v561_v19 = vmin.f32 %v553_v15, 0.0  ;;  %vm557_vm0 = vcmp.gt.f32.partialorder %v553_v15, 0.0 }
 0x2d3   :  { %v562_v21 = vmin.f32 %v554_v18, 0.0  ;;  %vm558_vm1 = vcmp.gt.f32.partialorder %v554_v18, 0.0 }
 0x2d4   :  { %v566_v22 = vmul.f32 1.442695, %v561_v19  ;;  %v550_v23 = vpop.permute.xlu1 %549 }
 0x2d5   :  { %v568_v24 = vmul.f32 1.442695, %v562_v21  ;;  %v555_v25 = vmul.f32 %v550_v23, %v508_v20 }
 0x2d6   :  { %691 = vpow2.f32 %v566_v22 }
 0x2d7   :  { %693 = vpow2.f32 %v568_v24  ;;  %v563_v26 = vmin.f32 %v555_v25, 0.0  ;;  %vm559_vm2 = vcmp.gt.f32.partialorder %v555_v25, 0.0 }
 0x2d9   :  { %v570_v27 = vmul.f32 1.442695, %v563_v26 }
 0x2db   :  { %695 = vpow2.f32 %v570_v27 }
 0x2dc   :  { %v690_v28 = vpop.eup %689 }
 0x2dd   :  { %v610_v29 = vadd.f32 -1.0, %v690_v28 }
 0x2df   :  { %v576_v30 = vsel %vm556_vm15, %v552_v8, %v610_v29 }
 0x2e0   :  { %v692_v31 = vpop.eup %691  ;;  %580 = vst [vmem:[#allocation5] sm:$0xff] %v576_v30 }
 0x2e1   :  { %v694_v32 = vpop.eup %693  ;;  %v611_v33 = vadd.f32 -1.0, %v692_v31 }
 0x2e2   :  { %v612_v34 = vadd.f32 -1.0, %v694_v32 }
 0x2e3   :  { %v577_v35 = vsel %vm557_vm0, %v553_v15, %v611_v33 }
 0x2e4   :  { %581 = vst [vmem:[#allocation5 + $0x8] sm:$0xff] %v577_v35  ;;  %v578_v36 = vsel %vm558_vm1, %v554_v18, %v612_v34 }
 0x2e5   :  { %v696_v37 = vpop.eup %695  ;;  %582 = vst [vmem:[#allocation5 + $0x10] sm:$0xff] %v578_v36 }
 0x2e6   :  { %v613_v38 = vadd.f32 -1.0, %v696_v37 }
 0x2e8   :  { %v579_v39 = vsel %vm559_vm2, %v555_v25, %v613_v38 }
 0x2e9   :  { %583 = vst [vmem:[#allocation5 + $0x18] sm:$0xff] %v579_v39 }
 0x2ea   :  { %708 = shalt.err (!%p705_p4)
}
 0x2eb   :  { %s709_s23 = scalar_lea.hbm %s867_s5, 512 }
 0x2ec   :  { %p710_p5 = scmp.ne.s32.totalorder %s867_s5, %s709_s23  ;;  %p713_p6 = scmp.lt.u32.totalorder %s709_s23, %s867_s5 }
 0x2ee   :  { %p715_p7 = pnand %p713_p6, %p710_p5 }
 0x2f0   :  { %718 = shalt.err (!%p715_p7)
}
 0x2f1   :  { %s725_s28 = smov 128   ;;  %s726_s29 = smov 8  }
 0x2f2   :  { %595 = dma.vmem_to_hbm [thread:$0]  %s590_s3, 512, %s867_s5, [#allocation6], %s725_s28, %s725_s28, %s726_s29  }
 0x2f3   :  { %719 = dma.done.wait [#allocation6], 512  }
 0x2f4   :  { %720 = vsyncadd [#allocation6], 4294966784 }
 0x2f5   :  { %599 = vsyncpa [#allocation6], 1 }

</bundles_post_ra>
